<compile_context>
chip_gen: v5e
topology: v5e:2x2
jax: 0.10.0
libtpu: 0.0.40
codegen_flags: <defaults>
</compile_context>

<pallas_src>
import jax
import jax.numpy as jnp
from jax.experimental import pallas as pl
from jax.experimental.pallas import tpu as pltpu


def make_mask(im_size: int, rad: float) -> jnp.ndarray:
    """Replicates Mask.__init__: circular mask on a [-1, 1]^2 grid."""
    lin = jnp.linspace(-1.0, 1.0, im_size)
    # mask[i, j] = (lin[j]^2 + lin[i]^2) < rad^2
    mask = (lin[None, :] ** 2 + lin[:, None] ** 2) < (rad ** 2)
    return mask.astype(jnp.float32)


def _mask_kernel(x_ref, m_ref, o_ref):
    # (TB, TN) * (1, TN) broadcast multiply; lane-dense, unmasked stores.
    o_ref[...] = (x_ref[...] * m_ref[...]).astype(o_ref.dtype)


def _block_budget_bytes() -> int:
    """Per-generation block budget. v7x (64 MiB VMEM, 3.2 TB/s HBM) gets a
    slightly larger block to amortize the ~0.35 us/step overhead; 128 MiB
    chips (v5e/v6e) use 4 MiB. Falls back to 4 MiB if the probe fails."""
    try:
        vmem = int(pltpu.get_tpu_info().vmem_capacity_bytes)
        if vmem <= (64 << 20):       # v7x-class
            return 6 << 20
        return 4 << 20               # v5e / v6e class
    except Exception:
        return 4 << 20


def _pick_tiles(B: int, N: int, budget_bytes: int, itemsize: int):
    """Pick (TB, TN). Prefer full rows (TN = N, contiguous DMA); rows are a
    multiple of 8 or the full batch. Split lanes only if a single row block
    exceeds the budget. N is assumed to be a multiple of 128."""
    row_bytes = N * itemsize
    rows = budget_bytes // max(row_bytes, 1)
    if rows >= B:
        return B, N
    if rows >= 8:
        return (rows // 8) * 8, N
    # A full row (or 8 rows) doesn't fit the budget: split the lane axis.
    TB = 8 if B >= 8 else B
    lanes = max(128, (budget_bytes // (TB * itemsize) // 128) * 128)
    return TB, min(N, lanes)


def apply_mask(x: jnp.ndarray, mask: jnp.ndarray) -> jnp.ndarray:
    """Forward pass of Mask: x * mask, x shape (B, H, W), mask shape (H, W)."""
    B, H, W = x.shape
    assert mask.shape == (H, W)
    N = H * W

    x2 = x.reshape(B, N)                              # lane-dense 2-D view
    m2 = mask.reshape(1, N).astype(x.dtype)           # dtype-matched mask

    # Pad the lane dim to a multiple of 128 so stores stay unmasked.
    N_pad = ((N + 127) // 128) * 128
    if N_pad != N:
        x2 = jnp.pad(x2, ((0, 0), (0, N_pad - N)))
        m2 = jnp.pad(m2, ((0, 0), (0, N_pad - N)))

    itemsize = jnp.dtype(x.dtype).itemsize
    budget = _block_budget_bytes()
    TB, TN = _pick_tiles(B, N_pad, budget, itemsize)

    # Guarantee >=2 parallel batch blocks on medium+ inputs so both v7x
    # TensorCores get work (no effect on the tiny case or 1-TC chips).
    total_bytes = B * N_pad * itemsize
    if TB == B and TN == N_pad and B >= 16 and total_bytes >= (2 << 20):
        TB = max(8, ((B // 2) // 8) * 8)

    # Batch is the INNER grid axis: mask index (0, j) is constant across
    # consecutive steps -> fetched once per lane tile, not per batch tile.
    grid = (pl.cdiv(N_pad, TN), pl.cdiv(B, TB))

    out2 = pl.pallas_call(
        _mask_kernel,
        out_shape=jax.ShapeDtypeStruct((B, N_pad), x.dtype),
        grid_spec=pltpu.PrefetchScalarGridSpec(
            num_scalar_prefetch=0,
            grid=grid,
            in_specs=[
                pl.BlockSpec((TB, TN), lambda j, i: (i, j)),
                pl.BlockSpec((1, TN), lambda j, i: (0, j)),
            ],
            out_specs=pl.BlockSpec((TB, TN), lambda j, i: (i, j)),
        ),
        compiler_params=pltpu.CompilerParams(
            dimension_semantics=("parallel", "parallel"),
            vmem_limit_bytes=48 << 20,
        ),
        # TODO(synk): pass input_output_aliases={0: 0} when callers can donate x.
    )(x2, m2)

    if N_pad != N:
        out2 = out2[:, :N]
    return out2.reshape(B, H, W)


if __name__ == "__main__":
    im_size = 16
    rad = 0.8
    batch = 2

    # Deterministic parameters / inputs.
    mask = make_mask(im_size, rad)
    num_masked = float(jnp.sum(mask))  # mirrors self.num_masked (not used in forward)

    key = jax.random.PRNGKey(0)
    x = jax.random.normal(key, (batch, im_size, im_size), dtype=jnp.float32)

    out = apply_mask(x, mask)
    out = jax.block_until_ready(out)

    # Reference check against plain JAX broadcast multiply.
    ref = x * mask[None, :, :]
    assert out.shape == (batch, im_size, im_size)
    assert jnp.allclose(out, ref, atol=1e-6), "mismatch vs reference"

    print("KERNEL_OK")
</pallas_src>

<mosaic_0001>
module attributes {stable_mosaic.version = 11 : i64} {
  func.func @_mask_kernel(%arg0: i32, %arg1: i32, %arg2: memref<2x256xf32, #tpu.memory_space<vmem>>, %arg3: memref<1x256xf32, #tpu.memory_space<vmem>>, %arg4: memref<2x256xf32, #tpu.memory_space<vmem>>) attributes {dimension_semantics = [#tpu.dimension_semantics<parallel>, #tpu.dimension_semantics<parallel>], iteration_bounds = array<i64: 1, 1>, scalar_prefetch = 0 : i64, scratch_operands = 0 : i64, tpu.core_type = #tpu.core_type<tc>, window_params = [{transform_indices = @transform_0, window_bounds = array<i64: 2, 256>}, {transform_indices = @transform_1, window_bounds = array<i64: 1, 256>}, {transform_indices = @transform_2, window_bounds = array<i64: 2, 256>}]} {
    %c0 = arith.constant 0 : index
    %c0_0 = arith.constant 0 : index
    %0 = vector.load %arg2[%c0, %c0_0] : memref<2x256xf32, #tpu.memory_space<vmem>>, vector<2x256xf32>
    %c0_1 = arith.constant 0 : index
    %c0_2 = arith.constant 0 : index
    %1 = vector.load %arg3[%c0_1, %c0_2] : memref<1x256xf32, #tpu.memory_space<vmem>>, vector<1x256xf32>
    %2 = vector.broadcast %1 : vector<1x256xf32> to vector<2x256xf32>
    %3 = arith.mulf %0, %2 : vector<2x256xf32>
    %c0_3 = arith.constant 0 : index
    %c0_4 = arith.constant 0 : index
    %4 = vector.load %arg4[%c0_3, %c0_4] : memref<2x256xf32, #tpu.memory_space<vmem>>, vector<2x256xf32>
    tpu.vector_store %arg4[%c0_3, %c0_4], %3 {strides = array<i32>} : memref<2x256xf32, #tpu.memory_space<vmem>>, vector<2x256xf32>,
    return
  }
  func.func @transform_0(%arg0: i32, %arg1: i32) -> (i32, i32) {
    %c0_i32 = arith.constant 0 : i32
    return %arg1, %arg0 : i32, i32
  }
  func.func @transform_1(%arg0: i32, %arg1: i32) -> (i32, i32) {
    %c0_i32 = arith.constant 0 : i32
    %c0_i32_0 = arith.constant 0 : i32
    return %c0_i32, %arg0 : i32, i32
  }
  func.func @transform_2(%arg0: i32, %arg1: i32) -> (i32, i32) {
    %c0_i32 = arith.constant 0 : i32
    return %arg1, %arg0 : i32, i32
  }
}

</mosaic_0001>

<bundles_post_ra>
// kernel: tpu_custom_call.1
= control target key start
LH: loop header
LB: loop body
LE: loop exit
PB: predicated region body
PF: predicated region fallthrough
CT: control target
= control target key end

     0   :  { %7 = vsyncpa [#allocation3], 0  ;;  %s177_s0 = inlined_call_operand.hbm [shape: f32[2,256], index: 0, kind: input, shape index: {}]   ;;  %s178_s1 = inlined_call_operand.hbm [shape: f32[1,256], index: 1, kind: input, shape index: {}]   ;;  %s179_s2 = inlined_call_operand.hbm [shape: f32[2,256], index: 2, kind: output, shape index: {}]  }
   0x1   :  { %8 = vsyncpa [#allocation6], 0 }
   0x2   :  { %9 = vsyncpa [#allocation4], 0  ;;  %s15_s11 = sshll.u32 %s177_s0, 4  ;;  %s150_s12 = smov [#allocation2]   ;;  %s16_s11 = int_to_ptr.hbm [resolvable:$true] %s15_s11 }
   0x3   :  { %s17_s13 = sshll.u32 %s150_s12, 4  ;;  %s26_s16 = sshll.u32 %s178_s1, 4  ;;  %s18_s13 = int_to_ptr.vmem [resolvable:$true] %s17_s13  ;;  %s27_s16 = int_to_ptr.hbm [resolvable:$true] %s26_s16 }
   0x4   :  { %20 = dma.hbm_to_vmem [thread:$0]  %s16_s11, 64, %s18_s13, [#allocation3]  }
   0x5   :  { %s151_s17 = smov [#allocation5]  }
   0x6   :  { %s28_s18 = sshll.u32 %s151_s17, 4  ;;  %s29_s18 = int_to_ptr.vmem [resolvable:$true] %s28_s18 }
   0x7   :  { %31 = dma.hbm_to_vmem [thread:$0]  %s27_s16, 32, %s29_s18, [#allocation6]  }
   0x8   :  { %144 = dma.done.wait [#allocation3], 64  }
   0x9   :  { %145 = vsyncadd [#allocation3], 4294967232 }
   0xa   :  { %146 = dma.done.wait [#allocation6], 32  }
   0xb   :  { %147 = vsyncadd [#allocation6], 4294967264  ;;  %v41_v0 = vld [vmem:[#allocation5] sm:$0x3]  ;;  %vm46_vm0 = vcmask 1041408   ;;  %s152_s0 = smov [#allocation7]  }
   0xc   :  { %v43_v1 = vperm.slane %v41_v0, 0  ;;  %v44_v2 = vperm.slane %v41_v0, 1  ;;  %v40_v3 = vld [vmem:[#allocation2] sm:$0xf]  ;;  %s56_s19 = sshll.u32 %s152_s0, 4  ;;  %s58_s21 = sshll.u32 %s179_s2, 4  ;;  %s57_s19 = int_to_ptr.vmem [resolvable:$true] %s56_s19  ;;  %s59_s21 = int_to_ptr.hbm [resolvable:$true] %s58_s21 }
   0xe   :  { %v45_v4 = vrot.slane %v44_v2, 6 }
  0x10   :  { %v47_v5 = vsel %vm46_vm0, %v43_v1, %v45_v4 }
  0x11   :  { %v49_v6 = vmul.f32 %v47_v5, %v40_v3 }
  0x13   :  { %50 = vst [vmem:[#allocation7] sm:$0xf] %v49_v6 }
  0x14   :  { %61 = dma.vmem_to_hbm [thread:$0]  %s57_s19, 64, %s59_s21, [#allocation4]  }
  0x15   :  { %148 = dma.done.wait [#allocation4], 64  }
  0x16   :  { %149 = vsyncadd [#allocation4], 4294967232 }
  0x17   :  { %66 = vsyncpa [#allocation3], 1 }
  0x18   :  { %67 = vsyncpa [#allocation6], 1 }
  0x19   :  { %68 = vsyncpa [#allocation4], 1 }

</bundles_post_ra>
